<compile_context>
chip_gen: v6e
topology: v6e:2x2x1
jax: 0.10.0
libtpu: 0.0.40
codegen_flags: <defaults>
</compile_context>

<pallas_src>
import functools

import jax
import jax.numpy as jnp
from jax import lax
from jax.experimental import pallas as pl
from jax.experimental.pallas import tpu as pltpu


# ---------------------------------------------------------------------------
# Fused kernel: one batch element per grid step, width-packed (H, W*C) layout.
# ---------------------------------------------------------------------------
def _bottleneck_kernel(x_ref, w1_ref, b1_ref, w2_ref, b2_ref, w3_ref, b3_ref,
                       o_ref, *, H, WC_mid):
    x = x_ref[0]                                               # (H, W*Cin)

    # conv1 (1x1) + bn1 + relu : block-diagonal matmul on width-packed rows.
    h1 = jnp.dot(x, w1_ref[...], preferred_element_type=jnp.float32)
    h1 = jnp.maximum(h1 + b1_ref[...], 0.0)                    # (H, W*Cmid)

    # conv2 (3x3, pad=1) + bn2 + relu : one banded matmul per vertical tap.
    # Vertical padding = zero rows in the shifted copies; horizontal padding
    # is already folded into the banded weight (off-range taps are zero rows).
    zrow = jnp.zeros((1, WC_mid), jnp.float32)
    h1_up = jnp.concatenate([zrow, h1[:H - 1, :]], axis=0)     # input row y-1
    h1_dn = jnp.concatenate([h1[1:, :], zrow], axis=0)         # input row y+1
    acc = jnp.dot(h1_up, w2_ref[0:WC_mid, :],
                  preferred_element_type=jnp.float32)
    acc = acc + jnp.dot(h1, w2_ref[WC_mid:2 * WC_mid, :],
                        preferred_element_type=jnp.float32)
    acc = acc + jnp.dot(h1_dn, w2_ref[2 * WC_mid:3 * WC_mid, :],
                        preferred_element_type=jnp.float32)
    h2 = jnp.maximum(acc + b2_ref[...], 0.0)                   # (H, W*Cmid)

    # conv3 (1x1) + bn3, residual add (identity == raw input), final relu.
    h3 = jnp.dot(h2, w3_ref[...], preferred_element_type=jnp.float32)
    h3 = h3 + b3_ref[...]                                      # (H, W*Cout)
    o_ref[0] = jnp.maximum(h3 + x, 0.0).astype(o_ref.dtype)


def bottleneck_fused(x2d, w1b, b1r, w2b, b2r, w3b, b3r):
    N, H, WCin = x2d.shape
    WCmid = w1b.shape[1]
    WCout = w3b.shape[1]
    kernel = functools.partial(_bottleneck_kernel, H=H, WC_mid=WCmid)
    return pl.pallas_call(
        kernel,
        out_shape=jax.ShapeDtypeStruct((N, H, WCout), x2d.dtype),
        grid_spec=pltpu.PrefetchScalarGridSpec(
            num_scalar_prefetch=0,
            grid=(N,),
            in_specs=[
                pl.BlockSpec((1, H, WCin), lambda n: (n, 0, 0)),
                pl.BlockSpec((WCin, WCmid), lambda n: (0, 0)),
                pl.BlockSpec((1, WCmid), lambda n: (0, 0)),
                pl.BlockSpec((3 * WCmid, WCmid), lambda n: (0, 0)),
                pl.BlockSpec((1, WCmid), lambda n: (0, 0)),
                pl.BlockSpec((WCmid, WCout), lambda n: (0, 0)),
                pl.BlockSpec((1, WCout), lambda n: (0, 0)),
            ],
            out_specs=pl.BlockSpec((1, H, WCout), lambda n: (n, 0, 0)),
        ),
        compiler_params=pltpu.CompilerParams(
            dimension_semantics=("parallel",)),
    )(x2d, w1b, b1r, w2b, b2r, w3b, b3r)


# ---------------------------------------------------------------------------
# Module (parameters initialized deterministically in-script)
# ---------------------------------------------------------------------------
class BottleneckPallas:
    expansion = 4

    def __init__(self, key, in_channels, out_channels, i_downsample=None,
                 stride=1, eps=1e-5):
        assert i_downsample is None and stride == 1, \
            "only the stride=1 / no-downsample configuration is implemented"
        assert in_channels == out_channels * self.expansion, \
            "residual add with i_downsample=None requires in == out*expansion"
        c_in, c_mid = in_channels, out_channels
        c_out = out_channels * self.expansion
        ks = jax.random.split(key, 9)
        # Conv weights in PyTorch OIHW layout; nn.Conv2d default bias=True.
        self.w1 = 0.1 * jax.random.normal(ks[0], (c_mid, c_in, 1, 1), jnp.float32)
        self.b1 = 0.1 * jax.random.normal(ks[1], (c_mid,), jnp.float32)
        self.w2 = 0.1 * jax.random.normal(ks[2], (c_mid, c_mid, 3, 3), jnp.float32)
        self.b2 = 0.1 * jax.random.normal(ks[3], (c_mid,), jnp.float32)
        self.w3 = 0.1 * jax.random.normal(ks[4], (c_out, c_mid, 1, 1), jnp.float32)
        self.b3 = 0.1 * jax.random.normal(ks[5], (c_out,), jnp.float32)
        # BatchNorm running stats / affine (eval mode).
        self.bn1 = self._bn_params(ks[6], c_mid)
        self.bn2 = self._bn_params(ks[7], c_mid)
        self.bn3 = self._bn_params(ks[8], c_out)
        self.eps = eps
        self.stride = stride
        self.c_in, self.c_mid, self.c_out = c_in, c_mid, c_out

    @staticmethod
    def _bn_params(key, c):
        k1, k2, k3, k4 = jax.random.split(key, 4)
        gamma = 1.0 + 0.1 * jax.random.normal(k1, (c,), jnp.float32)
        beta = 0.1 * jax.random.normal(k2, (c,), jnp.float32)
        mean = 0.1 * jax.random.normal(k3, (c,), jnp.float32)
        var = 1.0 + 0.1 * jax.random.uniform(k4, (c,), jnp.float32)
        return gamma, beta, mean, var

    def _fold_bn(self, w_oihw, b_conv, bn):
        """Fold eval-mode BN (after the conv) into the conv weight/bias."""
        gamma, beta, mean, var = bn
        scale = gamma / jnp.sqrt(var + self.eps)
        return w_oihw * scale[:, None, None, None], \
            scale * b_conv + beta - scale * mean

    def _packed_params(self, W):
        """Build width-packed (lane-dense) weight matrices with BN folded in."""
        w1f, b1f = self._fold_bn(self.w1, self.b1, self.bn1)
        w2f, b2f = self._fold_bn(self.w2, self.b2, self.bn2)
        w3f, b3f = self._fold_bn(self.w3, self.b3, self.bn3)
        eye_w = jnp.eye(W, dtype=jnp.float32)
        # 1x1 convs -> block-diagonal matmuls on the width-packed layout.
        w1b = jnp.kron(eye_w, w1f[:, :, 0, 0].T)           # (W*Cin,  W*Cmid)
        w3b = jnp.kron(eye_w, w3f[:, :, 0, 0].T)           # (W*Cmid, W*Cout)
        # 3x3 conv -> banded matmuls (one band per vertical tap); the missing
        # off-range blocks realize the horizontal zero-padding for free.
        w2_hwio = jnp.transpose(w2f, (2, 3, 1, 0))         # (3,3,Cmid,Cmid)
        bands = []
        for ky in range(3):
            band = sum(jnp.kron(jnp.eye(W, W, k=1 - dx, dtype=jnp.float32),
                                w2_hwio[ky, dx]) for dx in range(3))
            bands.append(band)
        w2b = jnp.concatenate(bands, axis=0)               # (3*W*Cmid, W*Cmid)
        b1r = jnp.tile(b1f, W)[None, :]
        b2r = jnp.tile(b2f, W)[None, :]
        b3r = jnp.tile(b3f, W)[None, :]
        return w1b, b1r, w2b, b2r, w3b, b3r

    def __call__(self, x_nchw):
        N, C, H, W = x_nchw.shape
        assert C == self.c_in
        # NCHW -> width-packed slab (N, H, W*C): channels interleaved along
        # the 128-lane axis so every vreg / store is lane-dense.
        x2d = jnp.transpose(x_nchw, (0, 2, 3, 1)).reshape(N, H, W * C)
        out2d = bottleneck_fused(x2d, *self._packed_params(W))
        out = out2d.reshape(N, H, W, self.c_out)
        return jnp.transpose(out, (0, 3, 1, 2))            # back to NCHW


# ---------------------------------------------------------------------------
# Pure-JAX reference of the PyTorch forward (for a correctness check)
# ---------------------------------------------------------------------------
def reference_forward(block, x):
    dn = ('NCHW', 'OIHW', 'NCHW')

    def bn(z, p):
        g, b, m, v = p
        return g[None, :, None, None] * (z - m[None, :, None, None]) \
            / jnp.sqrt(v[None, :, None, None] + block.eps) \
            + b[None, :, None, None]

    identity = x
    z = lax.conv_general_dilated(x, block.w1, (1, 1), 'VALID',
                                 dimension_numbers=dn,
                                 precision=lax.Precision.HIGHEST)
    z = jax.nn.relu(bn(z + block.b1[None, :, None, None], block.bn1))
    z = lax.conv_general_dilated(z, block.w2, (1, 1), ((1, 1), (1, 1)),
                                 dimension_numbers=dn,
                                 precision=lax.Precision.HIGHEST)
    z = jax.nn.relu(bn(z + block.b2[None, :, None, None], block.bn2))
    z = lax.conv_general_dilated(z, block.w3, (1, 1), 'VALID',
                                 dimension_numbers=dn,
                                 precision=lax.Precision.HIGHEST)
    z = bn(z + block.b3[None, :, None, None], block.bn3)
    return jax.nn.relu(z + identity)


# ---------------------------------------------------------------------------
if __name__ == "__main__":
    key = jax.random.PRNGKey(0)
    k_param, k_input = jax.random.split(key)

    # Bottleneck with i_downsample=None & stride=1 needs in == out*expansion.
    N, out_channels, H, W = 2, 4, 16, 16
    in_channels = out_channels * BottleneckPallas.expansion   # 16

    block = BottleneckPallas(k_param, in_channels=in_channels,
                             out_channels=out_channels,
                             i_downsample=None, stride=1)

    x = jax.random.normal(k_input, (N, in_channels, H, W), jnp.float32)  # NCHW
    y = jax.block_until_ready(block(x))
    assert y.shape == (N, in_channels, H, W) and y.dtype == jnp.float32

    y_ref = jax.block_until_ready(reference_forward(block, x))
    max_err = float(jnp.max(jnp.abs(y - y_ref)))
    assert jnp.allclose(y, y_ref, atol=1e-3, rtol=1e-3), max_err

    print("KERNEL_OK")
</pallas_src>

<mosaic_0001>
module attributes {stable_mosaic.version = 11 : i64} {
  func.func @_bottleneck_kernel(%arg0: i32, %arg1: memref<1x16x256xf32, #tpu.memory_space<vmem>>, %arg2: memref<256x64xf32, #tpu.memory_space<vmem>>, %arg3: memref<1x64xf32, #tpu.memory_space<vmem>>, %arg4: memref<192x64xf32, #tpu.memory_space<vmem>>, %arg5: memref<1x64xf32, #tpu.memory_space<vmem>>, %arg6: memref<64x256xf32, #tpu.memory_space<vmem>>, %arg7: memref<1x256xf32, #tpu.memory_space<vmem>>, %arg8: memref<1x16x256xf32, #tpu.memory_space<vmem>>) attributes {dimension_semantics = [#tpu.dimension_semantics<parallel>], iteration_bounds = array<i64: 2>, scalar_prefetch = 0 : i64, scratch_operands = 0 : i64, tpu.core_type = #tpu.core_type<tc>, window_params = [{transform_indices = @transform_0, window_bounds = array<i64: 1, 16, 256>}, {pipeline_mode = #tpu.pipeline_mode<synchronous>, transform_indices = @transform_1, window_bounds = array<i64: 256, 64>}, {pipeline_mode = #tpu.pipeline_mode<synchronous>, transform_indices = @transform_2, window_bounds = array<i64: 1, 64>}, {pipeline_mode = #tpu.pipeline_mode<synchronous>, transform_indices = @transform_3, window_bounds = array<i64: 192, 64>}, {pipeline_mode = #tpu.pipeline_mode<synchronous>, transform_indices = @transform_4, window_bounds = array<i64: 1, 64>}, {pipeline_mode = #tpu.pipeline_mode<synchronous>, transform_indices = @transform_5, window_bounds = array<i64: 64, 256>}, {pipeline_mode = #tpu.pipeline_mode<synchronous>, transform_indices = @transform_6, window_bounds = array<i64: 1, 256>}, {transform_indices = @transform_7, window_bounds = array<i64: 1, 16, 256>}]} {
    %c0 = arith.constant 0 : index
    %c0_0 = arith.constant 0 : index
    %c0_1 = arith.constant 0 : index
    %0 = vector.load %arg1[%c0, %c0_0, %c0_1] : memref<1x16x256xf32, #tpu.memory_space<vmem>>, vector<1x16x256xf32>
    %1 = vector.shape_cast %0 : vector<1x16x256xf32> to vector<16x256xf32>
    %c0_2 = arith.constant 0 : index
    %c0_3 = arith.constant 0 : index
    %2 = vector.load %arg2[%c0_2, %c0_3] : memref<256x64xf32, #tpu.memory_space<vmem>>, vector<256x64xf32>
    %cst = arith.constant dense<0.000000e+00> : vector<16x64xf32>
    %3 = tpu.matmul %1, %2, %cst {dimension_numbers = #tpu.dot_dimension_numbers<[1], [0], [0], [1], [0, 0, 1, 1], [], []>} : vector<16x256xf32>, vector<256x64xf32>, vector<16x64xf32> -> vector<16x64xf32>
    %c0_4 = arith.constant 0 : index
    %c0_5 = arith.constant 0 : index
    %4 = vector.load %arg3[%c0_4, %c0_5] : memref<1x64xf32, #tpu.memory_space<vmem>>, vector<1x64xf32>
    %5 = vector.broadcast %4 : vector<1x64xf32> to vector<16x64xf32>
    %6 = arith.addf %3, %5 : vector<16x64xf32>
    %cst_6 = arith.constant 0.000000e+00 : f32
    %7 = vector.broadcast %cst_6 : f32 to vector<16x64xf32>
    %8 = arith.maximumf %6, %7 : vector<16x64xf32>
    %cst_7 = arith.constant 0.000000e+00 : f32
    %9 = vector.broadcast %cst_7 : f32 to vector<1x64xf32>
    %10 = vector.extract_strided_slice %8 {offsets = [0, 0], sizes = [15, 64], strides = [1, 1]} : vector<16x64xf32> to vector<15x64xf32>
    %11 = tpu.concatenate %9, %10 in 0 : vector<1x64xf32>, vector<15x64xf32> -> vector<16x64xf32>
    %12 = vector.extract_strided_slice %8 {offsets = [1, 0], sizes = [15, 64], strides = [1, 1]} : vector<16x64xf32> to vector<15x64xf32>
    %13 = tpu.concatenate %12, %9 in 0 : vector<15x64xf32>, vector<1x64xf32> -> vector<16x64xf32>
    %c0_8 = arith.constant 0 : index
    %c0_9 = arith.constant 0 : index
    %14 = vector.load %arg4[%c0_8, %c0_9] : memref<192x64xf32, #tpu.memory_space<vmem>>, vector<64x64xf32>
    %cst_10 = arith.constant dense<0.000000e+00> : vector<16x64xf32>
    %15 = tpu.matmul %11, %14, %cst_10 {dimension_numbers = #tpu.dot_dimension_numbers<[1], [0], [0], [1], [0, 0, 1, 1], [], []>} : vector<16x64xf32>, vector<64x64xf32>, vector<16x64xf32> -> vector<16x64xf32>
    %c64 = arith.constant 64 : index
    %c0_11 = arith.constant 0 : index
    %16 = vector.load %arg4[%c64, %c0_11] : memref<192x64xf32, #tpu.memory_space<vmem>>, vector<64x64xf32>
    %cst_12 = arith.constant dense<0.000000e+00> : vector<16x64xf32>
    %17 = tpu.matmul %8, %16, %cst_12 {dimension_numbers = #tpu.dot_dimension_numbers<[1], [0], [0], [1], [0, 0, 1, 1], [], []>} : vector<16x64xf32>, vector<64x64xf32>, vector<16x64xf32> -> vector<16x64xf32>
    %18 = arith.addf %15, %17 : vector<16x64xf32>
    %c128 = arith.constant 128 : index
    %c0_13 = arith.constant 0 : index
    %19 = vector.load %arg4[%c128, %c0_13] : memref<192x64xf32, #tpu.memory_space<vmem>>, vector<64x64xf32>
    %cst_14 = arith.constant dense<0.000000e+00> : vector<16x64xf32>
    %20 = tpu.matmul %13, %19, %cst_14 {dimension_numbers = #tpu.dot_dimension_numbers<[1], [0], [0], [1], [0, 0, 1, 1], [], []>} : vector<16x64xf32>, vector<64x64xf32>, vector<16x64xf32> -> vector<16x64xf32>
    %21 = arith.addf %18, %20 : vector<16x64xf32>
    %c0_15 = arith.constant 0 : index
    %c0_16 = arith.constant 0 : index
    %22 = vector.load %arg5[%c0_15, %c0_16] : memref<1x64xf32, #tpu.memory_space<vmem>>, vector<1x64xf32>
    %23 = vector.broadcast %22 : vector<1x64xf32> to vector<16x64xf32>
    %24 = arith.addf %21, %23 : vector<16x64xf32>
    %cst_17 = arith.constant 0.000000e+00 : f32
    %25 = vector.broadcast %cst_17 : f32 to vector<16x64xf32>
    %26 = arith.maximumf %24, %25 : vector<16x64xf32>
    %c0_18 = arith.constant 0 : index
    %c0_19 = arith.constant 0 : index
    %27 = vector.load %arg6[%c0_18, %c0_19] : memref<64x256xf32, #tpu.memory_space<vmem>>, vector<64x256xf32>
    %cst_20 = arith.constant dense<0.000000e+00> : vector<16x256xf32>
    %28 = tpu.matmul %26, %27, %cst_20 {dimension_numbers = #tpu.dot_dimension_numbers<[1], [0], [0], [1], [0, 0, 1, 1], [], []>} : vector<16x64xf32>, vector<64x256xf32>, vector<16x256xf32> -> vector<16x256xf32>
    %c0_21 = arith.constant 0 : index
    %c0_22 = arith.constant 0 : index
    %29 = vector.load %arg7[%c0_21, %c0_22] : memref<1x256xf32, #tpu.memory_space<vmem>>, vector<1x256xf32>
    %30 = vector.broadcast %29 : vector<1x256xf32> to vector<16x256xf32>
    %31 = arith.addf %28, %30 : vector<16x256xf32>
    %32 = arith.addf %31, %1 : vector<16x256xf32>
    %cst_23 = arith.constant 0.000000e+00 : f32
    %33 = vector.broadcast %cst_23 : f32 to vector<16x256xf32>
    %34 = arith.maximumf %32, %33 : vector<16x256xf32>
    %c0_24 = arith.constant 0 : index
    %c0_25 = arith.constant 0 : index
    %c0_26 = arith.constant 0 : index
    %35 = vector.load %arg8[%c0_24, %c0_25, %c0_26] : memref<1x16x256xf32, #tpu.memory_space<vmem>>, vector<1x16x256xf32>
    %36 = vector.shape_cast %35 : vector<1x16x256xf32> to vector<16x256xf32>
    %37 = vector.shape_cast %34 : vector<16x256xf32> to vector<1x16x256xf32>
    tpu.vector_store %arg8[%c0_24, %c0_25, %c0_26], %37 {strides = array<i32>} : memref<1x16x256xf32, #tpu.memory_space<vmem>>, vector<1x16x256xf32>,
    return
  }
  func.func @transform_0(%arg0: i32) -> (i32, i32, i32) {
    %c0_i32 = arith.constant 0 : i32
    %c0_i32_0 = arith.constant 0 : i32
    %c0_i32_1 = arith.constant 0 : i32
    return %arg0, %c0_i32, %c0_i32_0 : i32, i32, i32
  }
  func.func @transform_1(%arg0: i32) -> (i32, i32) {
    %c0_i32 = arith.constant 0 : i32
    %c0_i32_0 = arith.constant 0 : i32
    %c0_i32_1 = arith.constant 0 : i32
    return %c0_i32, %c0_i32_0 : i32, i32
  }
  func.func @transform_2(%arg0: i32) -> (i32, i32) {
    %c0_i32 = arith.constant 0 : i32
    %c0_i32_0 = arith.constant 0 : i32
    %c0_i32_1 = arith.constant 0 : i32
    return %c0_i32, %c0_i32_0 : i32, i32
  }
  func.func @transform_3(%arg0: i32) -> (i32, i32) {
    %c0_i32 = arith.constant 0 : i32
    %c0_i32_0 = arith.constant 0 : i32
    %c0_i32_1 = arith.constant 0 : i32
    return %c0_i32, %c0_i32_0 : i32, i32
  }
  func.func @transform_4(%arg0: i32) -> (i32, i32) {
    %c0_i32 = arith.constant 0 : i32
    %c0_i32_0 = arith.constant 0 : i32
    %c0_i32_1 = arith.constant 0 : i32
    return %c0_i32, %c0_i32_0 : i32, i32
  }
  func.func @transform_5(%arg0: i32) -> (i32, i32) {
    %c0_i32 = arith.constant 0 : i32
    %c0_i32_0 = arith.constant 0 : i32
    %c0_i32_1 = arith.constant 0 : i32
    return %c0_i32, %c0_i32_0 : i32, i32
  }
  func.func @transform_6(%arg0: i32) -> (i32, i32) {
    %c0_i32 = arith.constant 0 : i32
    %c0_i32_0 = arith.constant 0 : i32
    %c0_i32_1 = arith.constant 0 : i32
    return %c0_i32, %c0_i32_0 : i32, i32
  }
  func.func @transform_7(%arg0: i32) -> (i32, i32, i32) {
    %c0_i32 = arith.constant 0 : i32
    %c0_i32_0 = arith.constant 0 : i32
    %c0_i32_1 = arith.constant 0 : i32
    return %arg0, %c0_i32, %c0_i32_0 : i32, i32, i32
  }
}

</mosaic_0001>

<bundles_post_ra>
// kernel: tpu_custom_call.1
= control target key start
LH: loop header
LB: loop body
LE: loop exit
PB: predicated region body
PF: predicated region fallthrough
CT: control target
= control target key end

     0   :  { %12 = vsyncpa [#allocation3], 0  ;;  %s1543_s0 = inlined_call_operand.vmem [shape: f32[2,16,256], index: 0, kind: input, shape index: {}]   ;;  %s1544_s1 = inlined_call_operand.vmem [shape: f32[256,64], index: 1, kind: input, shape index: {}]   ;;  %s1545_s2 = inlined_call_operand.vmem [shape: f32[1,64], index: 2, kind: input, shape index: {}]   ;;  %s1546_s3 = inlined_call_operand.vmem [shape: f32[192,64], index: 3, kind: input, shape index: {}]   ;;  %s1547_s4 = inlined_call_operand.vmem [shape: f32[1,64], index: 4, kind: input, shape index: {}]   ;;  %s1548_s5 = inlined_call_operand.vmem [shape: f32[64,256], index: 5, kind: input, shape index: {}]   ;;  %s1549_s6 = inlined_call_operand.vmem [shape: f32[1,256], index: 6, kind: input, shape index: {}]   ;;  %s1550_s7 = inlined_call_operand.hbm [shape: f32[2,16,256], index: 7, kind: output, shape index: {}]  }
   0x1   :  { %14 = vsyncpa [#allocation3 + $0x1], 0  ;;  %s1184_s24 = smov 0   ;;  %s1186_s25 = smov 0  }
   0x2   :  { %s1188_s26 = smov 0   ;;  %s1190_s27 = smov 0  }
   0x3 LB: > { %s1205_s28 = sadd.s32 4294967295, %s1138_s27   ;;  %s887_s29 = sadd.s32 4294967294, %s1138_s27   ;;  %s1138_s27 = sphi %s1190_s27, %s1556_s27   ;;  %s1134_s26 = sphi %s1188_s26, %s1555_s26   ;;  %s1130_s25 = sphi %s1186_s25, %s1554_s25   ;;  %s1126_s24 = sphi %s1184_s24, %s1553_s24  }
   0x4   : > { %s1209_s30 = sadd.s32 1, %s1138_s27   ;;  %s179_s8 = sadd.s32 1, %s1134_s26 }
   0x5   : > { %s176_s9 = ssub.s32 %s1138_s27, %s1209_s30  ;;  %p189_p0 = scmp.ne.s32.totalorder %s1134_s26, %s1130_s25 }
   0x6   : > { %p177_p1 = scmp.eq.s32.totalorder %s176_s9, 0  ;;  %p190_p2 = scmp.eq.s32.totalorder %s1205_s28, 1 }
   0x7   : > { %p195_p3 = scmp.ne.s32.totalorder %s1130_s25, %s1126_s24  ;;  %p196_p4 = scmp.eq.s32.totalorder %s887_s29, 1 }
   0x8   : > { %s1220_s10 = scalar_select %p177_p1, %s1134_s26, %s179_s8  }
   0x9   : > { %p1222_p5 = por %p190_p2, %p189_p0  ;;  %p1226_p6 = por %p196_p4, %p195_p3 }
   0xa   : > { %p890_p7 = scmp.ge.s32.totalorder %s1138_s27, 1  ;;  %p240_p8 = scmp.lt.s32.totalorder %s1138_s27, 3 }
   0xc   : > { %p241_p9 = pnand %p890_p7, %p240_p8 }
   0xd   : > { %p272_p10 = scmp.lt.s32.totalorder (!%p241_p9), %s1205_s28, 1  ;;  %s269_s17 = sand.u32 (!%p241_p9), 1, %s1130_s25  }
   0xe   : > { %244 = sbr.rel (%p241_p9) target bundleno = 695 (0x2b7), region = 48  ;;  %s891_s18 = sshll.u32 (!%p241_p9), %s269_s17, 5 }
   0xf   : > { %s271_s19 = scalar_lea.vmem (!%p241_p9), [#allocation2], %s891_s18  ;;  %s910_s21 = sshll.u32 (!%p241_p9), %s1205_s28, 9 }
  0x10   : > { %s825_s20 = sshll.u32 (!%p241_p9), %s271_s19, 4  ;;  %s1501_s8 = scalar_lea.hbm (!%p241_p9), %s1550_s7, %s910_s21  ;;  %s1496_s20 = int_to_ptr.vmem [resolvable:$true] %s825_s20 }
  0x11   : > { %s1141_s9 = smov (!%p241_p9), [#allocation2]  }
  0x12   : > { %s1082_s13 = sshll.u32 (!%p241_p9), %s1141_s9, 4  ;;  %s1083_s13 = int_to_ptr.vmem [resolvable:$false] %s1082_s13 }
  0x13   : > { %v312_v0 = vld [vmem:[%s1544_s1 + $0xf8] sm:$0xff]  ;;  %v311_v2 = vld [vmem:[%s1544_s1 + $0xf0] sm:$0xff]  ;;  %v310_v4 = vld [vmem:[%s1544_s1 + $0xe8] sm:$0xff]  ;;  %s273_s23 = scalar_select %p272_p10, %s1205_s28, 1  ;;  %vm427_vm0 = vcmask 523264   ;;  %vm399_vm1 = vcmask 1040384  }
  0x14   : > { %v296_v1 = vld [vmem:[%s1544_s1 + $0x78] sm:$0xff]  ;;  %911 = vmatprep.subr.mxu0 %v312_v0  ;;  %v295_v3 = vld [vmem:[%s1544_s1 + $0x70] sm:$0xff]  ;;  %v294_v5 = vld [vmem:[%s1544_s1 + $0x68] sm:$0xff]  ;;  %vm405_vm2 = vcmask 1046528   ;;  %s1078_s28 = scalar_lea.vmem %s1496_s20, 512  ;;  %s1084_s15 = scalar_lea.vmem %s1083_s13, 1024 }
  0x15   : > { %912 = vmatpush3.msra.mxu0 %v296_v1  ;;  %v309_v6 = vld [vmem:[%s1544_s1 + $0xe0] sm:$0xff]  ;;  %s909_s14 = sshll.u32 %s273_s23, 5  ;;  %v308_v8 = vld [vmem:[%s1544_s1 + $0xd8] sm:$0xff]  ;;  %v307_v10 = vld [vmem:[%s1544_s1 + $0xd0] sm:$0xff]  ;;  %p1079_p11 = scmp.ne.s32.totalorder %s1496_s20, %s1078_s28 }
  0x16   : > { %913 = vmatprep.subr.mxu0 %v311_v2  ;;  %v293_v7 = vld [vmem:[%s1544_s1 + $0x60] sm:$0xff]  ;;  %v292_v9 = vld [vmem:[%s1544_s1 + $0x58] sm:$0xff]  ;;  %s1267_s29 = scalar_lea.vmem %s1543_s0, %s909_s14  ;;  %v291_v11 = vld [vmem:[%s1544_s1 + $0x50] sm:$0xff]  ;;  %p1085_p0 = scmp.lt.s32.totalorder %s1496_s20, %s1083_s13 }
  0x17   : > { %914 = vmatpush3.msra.mxu0 %v295_v3  ;;  %v306_v12 = vld [vmem:[%s1544_s1 + $0xc8] sm:$0xff]  ;;  %v305_v15 = vld [vmem:[%s1544_s1 + $0xc0] sm:$0xff]  ;;  %v426_v16 = vld [vmem:[%s1546_s3 + $0x78] sm:$0xff]  ;;  %p1080_p12 = pnand %p1079_p11, %p1222_p5  ;;  %p1086_p1 = scmp.lt.s32.totalorder %s1084_s15, %s1078_s28 }
  0x18   : > { %915 = vmatprep.subr.mxu0 %v310_v4  ;;  %v1279_v13 = vld [vmem:[%s1267_s29 + $0x8] sm:$0xff]  ;;  %v425_v17 = vld [vmem:[%s1546_s3 + $0x70] sm:$0xff]  ;;  %v289_v18 = vld [vmem:[%s1544_s1 + $0x40] sm:$0xff]  ;;  %979 = vmatprep.subr.mxu1 %v426_v16 }
  0x19   : > { %916 = vmatpush3.msra.mxu0 %v294_v5  ;;  %v290_v14 = vld [vmem:[%s1544_s1 + $0x48] sm:$0xff]  ;;  %384 = vmatprep.mubr.f32.mxu0 %v1279_v13  ;;  %v304_v19 = vld [vmem:[%s1544_s1 + $0xb8] sm:$0xff]  ;;  %v303_v21 = vld [vmem:[%s1544_s1 + $0xb0] sm:$0xff]  ;;  %p1081_p13 = pneg %p1080_p12  ;;  %p1087_p2 = por %p1086_p1, %p1085_p0 }
  0x1a   : > { %917 = vmatprep.subr.mxu0 %v309_v6  ;;  %980 = vmatpush3.msra.mxu1 %v426_v16  ;;  %v288_v20 = vld [vmem:[%s1544_s1 + $0x38] sm:$0xff]  ;;  %v287_v22 = vld [vmem:[%s1544_s1 + $0x30] sm:$0xff]  ;;  %v302_v23 = vld [vmem:[%s1544_s1 + $0xa8] sm:$0xff] }
  0x1b   : > { %918 = vmatpush3.msra.mxu0 %v293_v7  ;;  %981 = vmatprep.subr.mxu1 %v425_v17  ;;  %v286_v24 = vld [vmem:[%s1544_s1 + $0x28] sm:$0xff]  ;;  %v301_v25 = vld [vmem:[%s1544_s1 + $0xa0] sm:$0xff]  ;;  %v300_v27 = vld [vmem:[%s1544_s1 + $0x98] sm:$0xff]  ;;  %p1088_p3 = pnand %p1087_p2, %p1081_p13 }
  0x1c   : > { %919 = vmatprep.subr.mxu0 %v308_v8  ;;  %982 = vmatpush3.msra.mxu1 %v425_v17  ;;  %v285_v26 = vld [vmem:[%s1544_s1 + $0x20] sm:$0xff]  ;;  %v284_v28 = vld [vmem:[%s1544_s1 + $0x18] sm:$0xff]  ;;  %v299_v29 = vld [vmem:[%s1544_s1 + $0x90] sm:$0xff] }
  0x1d   : > { %920 = vmatpush3.msra.mxu0 %v292_v9  ;;  %v283_v30 = vld [vmem:[%s1544_s1 + $0x10] sm:$0xff]  ;;  %v298_v31 = vld [vmem:[%s1544_s1 + $0x88] sm:$0xff]  ;;  %v297_v33 = vld [vmem:[%s1544_s1 + $0x80] sm:$0xff] }
  0x1e   : > { %921 = vmatprep.subr.mxu0 %v307_v10  ;;  %v282_v32 = vld [vmem:[%s1544_s1 + $0x8] sm:$0xff]  ;;  %v281_v34 = vld [vmem:[%s1544_s1] sm:$0xff]  ;;  %v1349_v36 = vld [vmem:[%s1267_s29 + $0x18] sm:$0xff] }
  0x1f   : > { %922 = vmatpush3.msra.mxu0 %v291_v11  ;;  %v1346_v35 = vld [vmem:[%s1267_s29] sm:$0xff]  ;;  %v1354_v37 = vld [vmem:[%s1267_s29 + $0x10] sm:$0xff]  ;;  %v424_v38 = vld [vmem:[%s1546_s3 + $0x68] sm:$0xff]  ;;  %s1503_s29 = scalar_lea.sflag [#allocation3], %s269_s17 }
  0x20   : > { %923 = vmatprep.subr.mxu0 %v306_v12  ;;  %983 = vmatprep.subr.mxu1 %v424_v38  ;;  %v594_v39 = vld [vmem:[%s1546_s3 + $0xb8] sm:$0xff]  ;;  %v423_v40 = vld [vmem:[%s1546_s3 + $0x60] sm:$0xff]  ;;  %v593_v41 = vld [vmem:[%s1546_s3 + $0xb0] sm:$0xff] }
  0x21   : > { %924 = vmatpush3.msra.mxu0 %v290_v14  ;;  %984 = vmatpush3.msra.mxu1 %v424_v38  ;;  %v422_v42 = vld [vmem:[%s1546_s3 + $0x58] sm:$0xff]  ;;  %v592_v43 = vld [vmem:[%s1546_s3 + $0xa8] sm:$0xff]  ;;  %v421_v44 = vld [vmem:[%s1546_s3 + $0x50] sm:$0xff] }
  0x22   : > { %925 = vmatprep.subr.mxu0 %v305_v15  ;;  %985 = vmatprep.subr.mxu1 %v423_v40  ;;  %v591_v45 = vld [vmem:[%s1546_s3 + $0xa0] sm:$0xff]  ;;  %v420_v46 = vld [vmem:[%s1546_s3 + $0x48] sm:$0xff]  ;;  %v590_v47 = vld [vmem:[%s1546_s3 + $0x98] sm:$0xff] }
  0x23   : > { %926 = vmatpush3.msra.mxu0 %v289_v18  ;;  %986 = vmatpush3.msra.mxu1 %v423_v40  ;;  %v419_v48 = vld [vmem:[%s1546_s3 + $0x40] sm:$0xff]  ;;  %v589_v49 = vld [vmem:[%s1546_s3 + $0x90] sm:$0xff]  ;;  %v418_v50 = vld [vmem:[%s1546_s3 + $0x38] sm:$0xff] }
  0x24   : > { %927 = vmatprep.subr.mxu0 %v304_v19  ;;  %987 = vmatprep.subr.mxu1 %v422_v42  ;;  %v588_v51 = vld [vmem:[%s1546_s3 + $0x88] sm:$0xff]  ;;  %v587_v52 = vld [vmem:[%s1546_s3 + $0x80] sm:$0xff]  ;;  %v417_v1 = vld [vmem:[%s1546_s3 + $0x30] sm:$0xff] }
  0x25   : > { %928 = vmatpush3.msra.mxu0 %v288_v20  ;;  %988 = vmatpush3.msra.mxu1 %v422_v42  ;;  %v894_v54 = vld [vmem:[%s1545_s2] ss:$0 sm:$0xff]  ;;  %v416_v5 = vld [vmem:[%s1546_s3 + $0x28] sm:$0xff]  ;;  %v414_v9 = vld [vmem:[%s1546_s3 + $0x18] sm:$0xff] }
  0x26   : > { %929 = vmatprep.subr.mxu0 %v303_v21  ;;  %989 = vmatprep.subr.mxu1 %v421_v44  ;;  %v415_v8 = vld [vmem:[%s1546_s3 + $0x20] sm:$0xff]  ;;  %v413_v10 = vld [vmem:[%s1546_s3 + $0x10] sm:$0xff]  ;;  %v412_v11 = vld [vmem:[%s1546_s3 + $0x8] sm:$0xff] }
  0x27   : > { %930 = vmatpush3.msra.mxu0 %v287_v22  ;;  %990 = vmatpush3.msra.mxu1 %v421_v44  ;;  %v411_v14 = vld [vmem:[%s1546_s3] sm:$0xff]  ;;  %v703_v16 = vld [vmem:[%s1548_s5 + $0x78] sm:$0xff]  ;;  %v702_v17 = vld [vmem:[%s1548_s5 + $0x70] sm:$0xff] }
  0x28   : > { %931 = vmatprep.subr.mxu0 %v302_v23  ;;  %991 = vmatprep.subr.mxu1 %v420_v46  ;;  %v701_v18 = vld [vmem:[%s1548_s5 + $0x68] sm:$0xff]  ;;  %v700_v19 = vld [vmem:[%s1548_s5 + $0x60] sm:$0xff]  ;;  %v699_v20 = vld [vmem:[%s1548_s5 + $0x58] sm:$0xff] }
  0x29   : > { %932 = vmatpush3.msra.mxu0 %v286_v24  ;;  %992 = vmatpush3.msra.mxu1 %v420_v46  ;;  %v698_v21 = vld [vmem:[%s1548_s5 + $0x50] sm:$0xff]  ;;  %v697_v22 = vld [vmem:[%s1548_s5 + $0x48] sm:$0xff]  ;;  %v696_v23 = vld [vmem:[%s1548_s5 + $0x40] sm:$0xff] }
  0x2a   : > { %933 = vmatprep.subr.mxu0 %v301_v25  ;;  %993 = vmatprep.subr.mxu1 %v419_v48  ;;  %v695_v24 = vld [vmem:[%s1548_s5 + $0x38] sm:$0xff]  ;;  %v694_v25 = vld [vmem:[%s1548_s5 + $0x30] sm:$0xff]  ;;  %v901_v46 = vld [vmem:[%s1547_s4] ss:$0 sm:$0xff] }
  0x2b   : > { %934 = vmatpush3.msra.mxu0 %v285_v26  ;;  %994 = vmatpush3.msra.mxu1 %v419_v48  ;;  %v693_v26 = vld [vmem:[%s1548_s5 + $0x28] sm:$0xff] }
  0x2c   : > { %935 = vmatprep.subr.mxu0 %v300_v27  ;;  %998 = vmatprep.subr.mxu1 %v418_v50  ;;  %v692_v27 = vld [vmem:[%s1548_s5 + $0x20] sm:$0xff] }
  0x2d   : > { %936 = vmatpush3.msra.mxu0 %v284_v28  ;;  %v691_v28 = vld [vmem:[%s1548_s5 + $0x18] sm:$0xff] }
  0x2e   : > { %937 = vmatprep.subr.mxu0 %v299_v29  ;;  %v690_v29 = vld [vmem:[%s1548_s5 + $0x10] sm:$0xff] }
  0x2f   : > { %938 = vmatpush3.msra.mxu0 %v283_v30  ;;  %v689_v30 = vld [vmem:[%s1548_s5 + $0x8] sm:$0xff] }
  0x30   : > { %939 = vmatprep.subr.mxu0 %v298_v31  ;;  %v688_v31 = vld [vmem:[%s1548_s5] sm:$0xff] }
  0x31   : > { %940 = vmatpush3.msra.mxu0 %v282_v32  ;;  %v1140_v32 = vmov 0.0  }
  0x32   : > { %941 = vmatprep.subr.mxu0 %v297_v33 }
  0x33   : > { %942 = vmatpush3.msra.mxu0 %v281_v34 }
  0x34   : > { %385 = vmatmul.mubr.f32.vlgmr.msra.gmra.mxu0 %v1346_v35  ;;  %1017 = vmatprep.subr.mxu0 %v594_v39 }
  0x35   : > { %389 = vmatprep.mubr.f32.mxu0 %v1349_v36  ;;  %1018 = vmatpush3.msra.mxu0 %v594_v39 }
  0x36   : > { %1019 = vmatprep.subr.mxu0 %v593_v41 }
  0x37   : > { %1020 = vmatpush3.msra.mxu0 %v593_v41 }
  0x38   : > { %390 = vmatmul.mubr.f32.gmra.mxu0 %v1354_v37  ;;  %1021 = vmatprep.subr.mxu0 %v592_v43 }
  0x39   : > { %1022 = vmatpush3.msra.mxu0 %v592_v43 }
  0x3a   : > { %1023 = vmatprep.subr.mxu0 %v591_v45 }
  0x3b   : > { %1024 = vmatpush3.msra.mxu0 %v591_v45 }
  0x3c   : > { %1025 = vmatprep.subr.mxu0 %v590_v47 }
  0x3d   : > { %1026 = vmatpush3.msra.mxu0 %v590_v47 }
  0x3e   : > { %1027 = vmatprep.subr.mxu0 %v589_v49 }
  0x3f   : > { %1028 = vmatpush3.msra.mxu0 %v589_v49 }
  0x40   : > { %1029 = vmatprep.subr.mxu0 %v588_v51 }
  0x41   : > { %1030 = vmatpush3.msra.mxu0 %v588_v51  ;;  %v706_v51 = vlaneseq }
  0x42   : > { %1031 = vmatprep.subr.mxu0 %v587_v52 }
  0x43   : > { %1032 = vmatpush3.msra.mxu0 %v587_v52  ;;  %v707_v52 = vshrl.u32 %v706_v51, 7 }
  0xf4   : > { %v943_v53 = vpop.f32.mrf.mxu0 }
  0xf6   : > { %v944_v55 = vpop.f32.mrf.mxu0 }
  0xf7   : > { %v945_v56 = vadd.f32 %v944_v55, %v943_v53  ;;  %v708_v53 = vsub.s32 0, %v707_v52  ;;  %v712_v55 = vsub.s32 1, %v707_v52 }
  0xf8   : > { %v946_v57 = vpop.f32.mrf.mxu0 }
  0xf9   : > { %v387_v58 = vadd.f32 %v945_v56, %v894_v54 }
  0xfa   : > { %v947_v59 = vpop.f32.mrf.mxu0 }
  0xfb   : > { %v395_v60 = vmax.f32 %v387_v58, 0.0  ;;  %v948_v61 = vadd.f32 %v947_v59, %v946_v57 }
  0xfd   : > { %v392_v62 = vadd.f32 %v948_v61, %v894_v54  ;;  %995 = vmatprep.mubr.msk.f32.mxu1 %vm427_vm0, %v395_v60  ;;  %v400_v63 = vrot.slane %v395_v60, 7  ;;  %v406_v2 = vrot.slane %v395_v60, 1  ;;  %v704_v54 = vld [vmem:[%s1549_s6] sm:$0x3] }
  0xfe   : > { %v709_v56 = vrot.slane %v704_v54, %v708_v53  ;;  %v713_v57 = vrot.slane %v704_v54, %v712_v55 }
  0xff   : > { %v396_v0 = vmax.f32 %v392_v62, 0.0  ;;  %v404_v4 = vsel %vm399_vm1, 0.0, %v400_v63 }
 0x101   : > { %v407_v3 = vrot.slane %v396_v0, 1  ;;  %996 = vmatmul.mubr.msk.f32.vlgmr.msra.gmra.mxu1 %vm427_vm0, %v396_v0  ;;  %v401_v12 = vrot.slane %v396_v0, 7 }
 0x102   : > { %999 = vmatpush3.msra.mxu1 %v418_v50  ;;  %1014 = vmatprep.mubr.msk.f32.mxu1 %vm427_vm0, %v404_v4 }
 0x103   : > { %1000 = vmatprep.subr.mxu1 %v417_v1  ;;  %v408_v6 = vsel %vm405_vm2, %v406_v2, %v407_v3  ;;  %v410_v7 = vsel %vm405_vm2, %v407_v3, 0.0  ;;  %v402_v15 = vsel %vm399_vm1, %v400_v63, %v401_v12 }
 0x104   : > { %1001 = vmatpush3.msra.mxu1 %v417_v1  ;;  %1033 = vmatprep.mubr.msk.f32.mxu0 %vm427_vm0, %v408_v6 }
 0x105   : > { %1002 = vmatprep.subr.mxu1 %v416_v5  ;;  %1034 = vmatmul.mubr.msk.f32.vlgmr.msra.gmra.mxu0 %vm427_vm0, %v410_v7 }
 0x106   : > { %1003 = vmatpush3.msra.mxu1 %v416_v5 }
 0x107   : > { %1004 = vmatprep.subr.mxu1 %v415_v8 }
 0x108   : > { %1005 = vmatpush3.msra.mxu1 %v415_v8 }
 0x109   : > { %1006 = vmatprep.subr.mxu1 %v414_v9 }
 0x10a   : > { %1007 = vmatpush3.msra.mxu1 %v414_v9 }
 0x10b   : > { %1008 = vmatprep.subr.mxu1 %v413_v10 }
 0x10c   : > { %1009 = vmatpush3.msra.mxu1 %v413_v10 }
 0x10d   : > { %1010 = vmatprep.subr.mxu1 %v412_v11 }
 0x10e   : > { %1011 = vmatpush3.msra.mxu1 %v412_v11 }
 0x10f   : > { %1012 = vmatprep.subr.mxu1 %v411_v14 }
 0x110   : > { %1013 = vmatpush3.msra.mxu1 %v411_v14 }
 0x111   : > { %1015 = vmatmul.mubr.msk.f32.vlgmr.msra.gmra.mxu1 %vm427_vm0, %v402_v15  ;;  %738 = vmatprep.subr.mxu1 %v703_v16 }
 0x112   : > { %739 = vmatpush1.msra.mxu1 %v702_v17  ;;  %786 = vmatprep.mubr.f32.mxu1 %v1140_v32 }
 0x113   : > { %740 = vmatprep.subr.mxu1 %v701_v18 }
 0x114   : > { %741 = vmatpush1.msra.mxu1 %v700_v19 }
 0x115   : > { %742 = vmatprep.subr.mxu1 %v699_v20 }
 0x116   : > { %743 = vmatpush1.msra.mxu1 %v698_v21 }
 0x117   : > { %744 = vmatprep.subr.mxu1 %v697_v22 }
 0x118   : > { %745 = vmatpush1.msra.mxu1 %v696_v23 }
 0x119   : > { %746 = vmatprep.subr.mxu1 %v695_v24 }
 0x11a   : > { %747 = vmatpush1.msra.mxu1 %v694_v25 }
 0x11b   : > { %748 = vmatprep.subr.mxu1 %v693_v26 }
 0x11c   : > { %749 = vmatpush1.msra.mxu1 %v692_v27 }
 0x11d   : > { %750 = vmatprep.subr.mxu1 %v691_v28 }
 0x11e   : > { %751 = vmatpush1.msra.mxu1 %v690_v29 }
 0x11f   : > { %752 = vmatprep.subr.mxu1 %v689_v30 }
 0x120   : > { %753 = vmatpush1.msra.mxu1 %v688_v31 }
 0x1c1   : > { %v997_v33 = vpop.f32.mrf.mxu1 }
 0x1c3   : > { %v498_v34 = vpop.f32.mrf.mxu1 }
 0x1c5   : > { %v1035_v38 = vpop.f32.mrf.mxu0 }
 0x1c7   : > { %v666_v43 = vpop.f32.mrf.mxu0 }
 0x1d1   : > { %v1016_v39 = vpop.f32.mrf.mxu1 }
 0x1d2   : > { %v584_v40 = vadd.f32 %v1016_v39, %v997_v33 }
 0x1d3   : > { %v578_v41 = vpop.f32.mrf.mxu1 }
 0x1d4   : > { %v579_v42 = vadd.f32 %v578_v41, %v498_v34  ;;  %v676_v44 = vadd.f32 %v1035_v38, %v584_v40 }
 0x1d6   : > { %v675_v45 = vadd.f32 %v666_v43, %v579_v42  ;;  %v685_v48 = vadd.f32 %v901_v46, %v676_v44 }
 0x1d8   : > { %v684_v47 = vadd.f32 %v901_v46, %v675_v45  ;;  %v687_v50 = vmax.f32 %v685_v48, 0.0 }
 0x1da   : > { %v686_v49 = vmax.f32 %v684_v47, 0.0 }
 0x1dc   : > { %902 = vmatmul.mubr.msk.f32.vlgmr.msra.gmra.mxu1 %vm427_vm0, %v686_v49 }
 0x1dd   : > { %792 = vmatprep.mubr.f32.mxu1 %v1140_v32 }
 0x1e0   : > { %903 = vmatmul.mubr.msk.f32.gmra.mxu1 %vm427_vm0, %v687_v50 }
 0x29c   : > { %v788_v58 = vpop.f32.mrf.mxu1 }
 0x29d   : > { %v789_v59 = vadd.f32 %v788_v58, %v709_v56 }
 0x29e   : > { %v790_v60 = vpop.f32.mrf.mxu1 }
 0x29f   : > { %v799_v61 = vadd.f32 %v789_v59, %v1346_v35  ;;  %v791_v62 = vadd.f32 %v790_v60, %v713_v57 }
 0x2a0   : > { %v794_v63 = vpop.f32.mrf.mxu1 }
 0x2a1   : > { %v803_v0 = vmax.f32 %v799_v61, 0.0  ;;  %v800_v1 = vadd.f32 %v791_v62, %v1279_v13  ;;  %v795_v2 = vadd.f32 %v794_v63, %v709_v56 }
 0x2a2   : > { %v796_v3 = vpop.f32.mrf.mxu1 }
 0x2a3   : > { %807 = vst [vmem:[%s271_s19] sm:$0xff] %v803_v0  ;;  %v804_v4 = vmax.f32 %v800_v1, 0.0  ;;  %v801_v5 = vadd.f32 %v795_v2, %v1354_v37  ;;  %v797_v6 = vadd.f32 %v796_v3, %v713_v57 }
 0x2a5   : > { %808 = vst [vmem:[%s271_s19 + $0x8] sm:$0xff] %v804_v4  ;;  %v805_v7 = vmax.f32 %v801_v5, 0.0  ;;  %v802_v35 = vadd.f32 %v797_v6, %v1349_v36 }
 0x2a7   : > { %809 = vst [vmem:[%s271_s19 + $0x10] sm:$0xff] %v805_v7  ;;  %v806_v13 = vmax.f32 %v802_v35, 0.0 }
 0x2a9   : > { %810 = vst [vmem:[%s271_s19 + $0x18] sm:$0xff] %v806_v13 }
 0x2aa   : > { %1091 = shalt.err (!%p1088_p3)
}
 0x2ab   : > { %s1092_s16 = scalar_lea.hbm %s1501_s8, 512  ;;  %s1096_s18 = scalar_lea.hbm %s1550_s7, 1024 }
 0x2ac   : > { %p1093_p4 = scmp.ne.s32.totalorder %s1501_s8, %s1092_s16  ;;  %p1097_p9 = scmp.lt.s32.totalorder %s1501_s8, %s1550_s7 }
 0x2ad   : > { %p1098_p10 = scmp.lt.s32.totalorder %s1096_s18, %s1092_s16 }
 0x2ae   : > { %p1094_p7 = pnand %p1093_p4, %p1222_p5 }
 0x2af   : > { %p1099_p11 = por %p1098_p10, %p1097_p9 }
 0x2b0   : > { %p1095_p8 = pneg %p1094_p7 }
 0x2b2   : > { %p1100_p12 = pnand %p1099_p11, %p1095_p8 }
 0x2b4   : > { %1103 = shalt.err (!%p1100_p12)
}
 0x2b5   : > { %s1142_s22 = smov 256   ;;  %s1143_s23 = smov 16  }
 0x2b6   : > { %1036 = dma.vmem_to_hbm [thread:$0]  (%p1222_p5), %s1496_s20, 512, %s1501_s8, %s1503_s29, %s1142_s22, %s1142_s22, %s1143_s23  }
 0x2b7 PF: > { %p1042_p13 = scmp.ge.s32.totalorder %s1138_s27, 2  ;;  %s840_s28 = sand.u32 1, %s1126_s24  }
 0x2b8   : > { %s841_s9 = scalar_lea.sflag [#allocation3], %s840_s28 }
 0x2b9   : > { %p1039_p0 = pnand %p1042_p13, %p1226_p6 }
 0x2bb   : > { %p1040_p1 = pneg %p1039_p0 }
 0x2bd   : > { %1121 = dma.done.wait (%p1040_p1), %s841_s9, 512  }
 0x2be   : > { %1123 = vsyncadd (%p1040_p1), %s841_s9, 4294966784  ;;  %p17_p2 = scmp.ge.s32.totalorder %s1209_s30, 4   ;;  %s1553_s24 = smov %s1130_s25 }
 0x2bf   : > { %s1554_s25 = smov %s1134_s26  ;;  %s1555_s26 = smov %s1220_s10 }
 0x2c0   : > { %s1556_s27 = smov %s1209_s30  ;;  %19 = sbr.rel (!%p17_p2) target bundleno = 3 (0x3), region = 83 }
 0x2c5   :  { %846 = vsyncpa [#allocation3], 1 }
 0x2c6   :  { %848 = vsyncpa [#allocation3 + $0x1], 1 }

</bundles_post_ra>
